<compile_context>
chip_gen: v7x
topology: tpu7x:2x2x1
jax: 0.10.0
libtpu: 0.0.40
codegen_flags: <defaults>
</compile_context>

<pallas_src>
import functools

import jax
import jax.numpy as jnp
from jax.experimental import pallas as pl
from jax.experimental.pallas import tpu as pltpu


def _round_up(x, m):
    return ((x + m - 1) // m) * m


def encoder_layer_kernel(x_ref, w_ref, b_ref, y_ref, acc_ref, *, latent_dim):
    k = pl.program_id(1)

    @pl.when(k == 0)
    def _():
        acc_ref[...] = jnp.zeros_like(acc_ref)

    # bf16 x bf16 -> f32 accumulation on the MXU.
    acc_ref[...] += jnp.dot(x_ref[...], w_ref[...],
                            preferred_element_type=jnp.float32)

    @pl.when(k == pl.num_programs(1) - 1)
    def _():
        y = acc_ref[...] + b_ref[...]                      # (tb, 2L_pad), f32
        # Softplus only on the covar lanes [L, 2L); mean lanes pass through.
        lane = jax.lax.broadcasted_iota(jnp.int32, y.shape, 1)
        is_covar = jnp.logical_and(lane >= latent_dim, lane < 2 * latent_dim)
        # Numerically stable softplus, computed in f32 before the final cast.
        softplus = jnp.maximum(y, 0.0) + jnp.log1p(jnp.exp(-jnp.abs(y)))
        y_ref[...] = jnp.where(is_covar, softplus, y).astype(y_ref.dtype)


def encoder_layer(feature, weight, bias, latent_dim, *,
                  batch_tile=None, k_tile=512):
    """feature: (B, F); weight: (F, 2*latent_dim) (transposed vs torch); bias: (2*latent_dim,)."""
    B, F = feature.shape
    two_l = weight.shape[1]
    assert two_l == 2 * latent_dim
    assert bias.shape == (two_l,)
    out_dtype = feature.dtype

    # Lane-dense padded output width (single fused output tile).
    two_l_p = _round_up(two_l, 128)

    # K (feature_dim) tiling.
    assert k_tile % 128 == 0, "k_tile must be a multiple of 128"
    if F <= k_tile:
        tk = _round_up(F, 128)
        F_p = tk
    else:
        tk = k_tile
        F_p = _round_up(F, tk)

    # Batch tiling: multiples of 16 (bf16 sublane packing), capped at 256 (MXU row dim).
    if batch_tile is None:
        tb = min(256, _round_up(B, 16))
    else:
        tb = batch_tile
    assert tb % 16 == 0, "batch_tile must be a multiple of 16 (bf16 sublanes)"
    B_p = _round_up(B, tb)

    # Pad + cast operands. Zero padding is exact for the matmul; padded output
    # columns/rows are sliced away in the wrapper.
    x_p = jnp.zeros((B_p, F_p), jnp.bfloat16).at[:B, :F].set(
        feature.astype(jnp.bfloat16))
    w_p = jnp.zeros((F_p, two_l_p), jnp.bfloat16).at[:F, :two_l].set(
        weight.astype(jnp.bfloat16))
    b_p = jnp.zeros((1, two_l_p), jnp.float32).at[0, :two_l].set(
        bias.astype(jnp.float32))

    grid = (B_p // tb, F_p // tk)

    # VMEM budget: double-buffered x / W / bias / output tiles + f32 accumulator.
    vmem_need = (2 * tb * tk * 2                      # x tile (bf16)
                 + 2 * tk * two_l_p * 2               # W tile (bf16)
                 + 2 * two_l_p * 4                    # bias tile (f32)
                 + 2 * tb * two_l_p * jnp.dtype(out_dtype).itemsize
                 + tb * two_l_p * 4)                  # accumulator
    vmem_limit = int(min(max(2 * vmem_need, 16 << 20), 56 << 20))  # v7x-safe cap

    y = pl.pallas_call(
        functools.partial(encoder_layer_kernel, latent_dim=latent_dim),
        out_shape=jax.ShapeDtypeStruct((B_p, two_l_p), out_dtype),
        grid_spec=pltpu.PrefetchScalarGridSpec(
            num_scalar_prefetch=0,
            grid=grid,
            in_specs=[
                pl.BlockSpec((tb, tk), lambda i, k: (i, k)),
                pl.BlockSpec((tk, two_l_p), lambda i, k: (k, 0)),
                pl.BlockSpec((1, two_l_p), lambda i, k: (0, 0)),
            ],
            out_specs=pl.BlockSpec((tb, two_l_p), lambda i, k: (i, 0)),
            scratch_shapes=[pltpu.VMEM((tb, two_l_p), jnp.float32)],
        ),
        compiler_params=pltpu.CompilerParams(
            dimension_semantics=("parallel", "arbitrary"),
            vmem_limit_bytes=vmem_limit,
        ),
    )(x_p, w_p, b_p)

    mean = y[:B, :latent_dim]
    covar = y[:B, latent_dim:two_l]
    return mean, covar


if __name__ == "__main__":
    # Small shapes consistent with the module: batch=8, feature_dim=32, latent_dim=16.
    # (At this toy size the kernel is launch-overhead dominated; the tiling above
    #  is what matters for realistic B / feature_dim.)
    B, FEAT, LATENT = 8, 32, 16

    key = jax.random.PRNGKey(0)
    kx, kw, kb = jax.random.split(key, 3)

    x = jax.random.normal(kx, (B, FEAT), dtype=jnp.float32)
    # "nn.Linear(feature_dim, 2*latent_dim)" params, stored as (in, out).
    w = jax.random.normal(kw, (FEAT, 2 * LATENT), dtype=jnp.float32) * (1.0 / FEAT**0.5)
    b = jax.random.normal(kb, (2 * LATENT,), dtype=jnp.float32) * 0.1

    mean, covar = encoder_layer(x, w, b, LATENT)
    jax.block_until_ready((mean, covar))
    assert mean.shape == (B, LATENT) and covar.shape == (B, LATENT)

    # Reference with the same bf16 operand rounding (tight tolerance).
    xb = x.astype(jnp.bfloat16).astype(jnp.float32)
    wb = w.astype(jnp.bfloat16).astype(jnp.float32)
    y_ref = xb @ wb + b
    mean_ref, c_ref = y_ref[:, :LATENT], y_ref[:, LATENT:]
    covar_ref = jnp.maximum(c_ref, 0.0) + jnp.log1p(jnp.exp(-jnp.abs(c_ref)))
    assert jnp.allclose(mean, mean_ref, atol=2e-3, rtol=2e-3)
    assert jnp.allclose(covar, covar_ref, atol=2e-3, rtol=2e-3)

    # Full-precision reference (loose tolerance covers bf16 operand rounding).
    y_f32 = x @ w + b
    mean_f32, c_f32 = y_f32[:, :LATENT], y_f32[:, LATENT:]
    covar_f32 = jnp.maximum(c_f32, 0.0) + jnp.log1p(jnp.exp(-jnp.abs(c_f32)))
    assert jnp.allclose(mean, mean_f32, atol=5e-2, rtol=5e-2)
    assert jnp.allclose(covar, covar_f32, atol=5e-2, rtol=5e-2)

    print("KERNEL_OK")
</pallas_src>

<mosaic_0001>
module attributes {stable_mosaic.version = 11 : i64} {
  func.func @encoder_layer_kernel(%arg0: i32, %arg1: i32, %arg2: memref<16x128xbf16, #tpu.memory_space<vmem>>, %arg3: memref<128x128xbf16, #tpu.memory_space<vmem>>, %arg4: memref<1x128xf32, #tpu.memory_space<vmem>>, %arg5: memref<16x128xf32, #tpu.memory_space<vmem>>, %arg6: memref<16x128xf32, #tpu.memory_space<vmem>>) attributes {dimension_semantics = [#tpu.dimension_semantics<parallel>, #tpu.dimension_semantics<arbitrary>], iteration_bounds = array<i64: 1, 1>, scalar_prefetch = 0 : i64, scratch_operands = 1 : i64, tpu.core_type = #tpu.core_type<tc>, window_params = [{transform_indices = @transform_0, window_bounds = array<i64: 16, 128>}, {transform_indices = @transform_1, window_bounds = array<i64: 128, 128>}, {pipeline_mode = #tpu.pipeline_mode<synchronous>, transform_indices = @transform_2, window_bounds = array<i64: 1, 128>}, {transform_indices = @transform_3, window_bounds = array<i64: 16, 128>}]} {
    %c0_i32 = arith.constant 0 : i32
    %0 = arith.cmpi eq, %arg1, %c0_i32 : i32
    %1 = arith.extui %0 : i1 to i32
    %c0_i32_0 = arith.constant 0 : i32
    %2 = arith.cmpi ne, %1, %c0_i32_0 : i32
    scf.if %2 {
      %cst_10 = arith.constant 0.000000e+00 : f32
      %12 = vector.broadcast %cst_10 : f32 to vector<16x128xf32>
      %c0_11 = arith.constant 0 : index
      %c0_12 = arith.constant 0 : index
      %13 = vector.load %arg6[%c0_11, %c0_12] : memref<16x128xf32, #tpu.memory_space<vmem>>, vector<16x128xf32>
      tpu.vector_store %arg6[%c0_11, %c0_12], %12 {strides = array<i32>} : memref<16x128xf32, #tpu.memory_space<vmem>>, vector<16x128xf32>,
    } else {
    }
    %c0 = arith.constant 0 : index
    %c0_1 = arith.constant 0 : index
    %3 = vector.load %arg6[%c0, %c0_1] : memref<16x128xf32, #tpu.memory_space<vmem>>, vector<16x128xf32>
    %c0_2 = arith.constant 0 : index
    %c0_3 = arith.constant 0 : index
    %4 = vector.load %arg2[%c0_2, %c0_3] : memref<16x128xbf16, #tpu.memory_space<vmem>>, vector<16x128xbf16>
    %c0_4 = arith.constant 0 : index
    %c0_5 = arith.constant 0 : index
    %5 = vector.load %arg3[%c0_4, %c0_5] : memref<128x128xbf16, #tpu.memory_space<vmem>>, vector<128x128xbf16>
    %cst = arith.constant dense<0.000000e+00> : vector<16x128xf32>
    %6 = tpu.matmul %4, %5, %cst {dimension_numbers = #tpu.dot_dimension_numbers<[1], [0], [0], [1], [0, 0, 1, 1], [], []>} : vector<16x128xbf16>, vector<128x128xbf16>, vector<16x128xf32> -> vector<16x128xf32>
    %7 = arith.addf %3, %6 : vector<16x128xf32>
    %c0_6 = arith.constant 0 : index
    %c0_7 = arith.constant 0 : index
    %8 = vector.load %arg6[%c0_6, %c0_7] : memref<16x128xf32, #tpu.memory_space<vmem>>, vector<16x128xf32>
    tpu.vector_store %arg6[%c0_6, %c0_7], %7 {strides = array<i32>} : memref<16x128xf32, #tpu.memory_space<vmem>>, vector<16x128xf32>,
    %c0_i32_8 = arith.constant 0 : i32
    %9 = arith.cmpi eq, %arg1, %c0_i32_8 : i32
    %10 = arith.extui %9 : i1 to i32
    %c0_i32_9 = arith.constant 0 : i32
    %11 = arith.cmpi ne, %10, %c0_i32_9 : i32
    scf.if %11 {
      %c0_10 = arith.constant 0 : index
      %c0_11 = arith.constant 0 : index
      %12 = vector.load %arg6[%c0_10, %c0_11] : memref<16x128xf32, #tpu.memory_space<vmem>>, vector<16x128xf32>
      %c0_12 = arith.constant 0 : index
      %c0_13 = arith.constant 0 : index
      %13 = vector.load %arg4[%c0_12, %c0_13] : memref<1x128xf32, #tpu.memory_space<vmem>>, vector<1x128xf32>
      %14 = vector.broadcast %13 : vector<1x128xf32> to vector<16x128xf32>
      %15 = arith.addf %12, %14 : vector<16x128xf32>
      %16 = tpu.iota {dimensions = array<i32: 1>} : vector<16x128xi32>
      %c16_i32 = arith.constant 16 : i32
      %17 = vector.broadcast %c16_i32 : i32 to vector<16x128xi32>
      %18 = arith.cmpi sge, %16, %17 : vector<16x128xi32>
      %c32_i32 = arith.constant 32 : i32
      %19 = vector.broadcast %c32_i32 : i32 to vector<16x128xi32>
      %20 = arith.cmpi slt, %16, %19 : vector<16x128xi32>
      %21 = arith.andi %18, %20 : vector<16x128xi1>
      %cst_14 = arith.constant 0.000000e+00 : f32
      %22 = vector.broadcast %cst_14 : f32 to vector<16x128xf32>
      %23 = arith.maximumf %15, %22 : vector<16x128xf32>
      %24 = math.absf %15 : vector<16x128xf32>
      %cst_15 = arith.constant 0.000000e+00 : f32
      %25 = vector.broadcast %cst_15 : f32 to vector<16x128xf32>
      %26 = arith.subf %25, %24 : vector<16x128xf32>
      %27 = math.exp %26 : vector<16x128xf32>
      %28 = math.log1p %27 : vector<16x128xf32>
      %29 = arith.addf %23, %28 : vector<16x128xf32>
      %30 = arith.select %21, %29, %15 : vector<16x128xi1>, vector<16x128xf32>
      %c0_16 = arith.constant 0 : index
      %c0_17 = arith.constant 0 : index
      %31 = vector.load %arg5[%c0_16, %c0_17] : memref<16x128xf32, #tpu.memory_space<vmem>>, vector<16x128xf32>
      tpu.vector_store %arg5[%c0_16, %c0_17], %30 {strides = array<i32>} : memref<16x128xf32, #tpu.memory_space<vmem>>, vector<16x128xf32>,
    } else {
    }
    return
  }
  func.func @transform_0(%arg0: i32, %arg1: i32) -> (i32, i32) {
    %c0_i32 = arith.constant 0 : i32
    return %arg0, %arg1 : i32, i32
  }
  func.func @transform_1(%arg0: i32, %arg1: i32) -> (i32, i32) {
    %c0_i32 = arith.constant 0 : i32
    %c0_i32_0 = arith.constant 0 : i32
    return %arg1, %c0_i32 : i32, i32
  }
  func.func @transform_2(%arg0: i32, %arg1: i32) -> (i32, i32) {
    %c0_i32 = arith.constant 0 : i32
    %c0_i32_0 = arith.constant 0 : i32
    %c0_i32_1 = arith.constant 0 : i32
    return %c0_i32, %c0_i32_0 : i32, i32
  }
  func.func @transform_3(%arg0: i32, %arg1: i32) -> (i32, i32) {
    %c0_i32 = arith.constant 0 : i32
    %c0_i32_0 = arith.constant 0 : i32
    return %arg0, %c0_i32 : i32, i32
  }
}

</mosaic_0001>

<bundles_post_ra>
// kernel: tpu_custom_call.1
= control target key start
LH: loop header
LB: loop body
LE: loop exit
PB: predicated region body
PF: predicated region fallthrough
CT: control target
= control target key end

     0   :  { %8 = vsyncpa [#allocation4], 0  ;;  %s445_s0 = inlined_call_operand.hbm [shape: bf16[16,128], index: 0, kind: input, shape index: {}]   ;;  %s446_s1 = inlined_call_operand.hbm [shape: bf16[128,128], index: 1, kind: input, shape index: {}]   ;;  %s447_s2 = inlined_call_operand.vmem [shape: f32[1,128], index: 2, kind: input, shape index: {}]   ;;  %s448_s3 = inlined_call_operand.hbm [shape: f32[16,128], index: 3, kind: output, shape index: {}]  }
   0x1   :  { %9 = vsyncpa [#allocation7], 0 }
   0x2   :  { %10 = vsyncpa [#allocation5], 0  ;;  %s377_s12 = smov [#allocation3]   ;;  %s305_s16 = scalar_lea.hbm %s445_s0, 128 }
   0x3   :  { %s16_s13 = sshll.u32 %s377_s12, 4  ;;  %p306_p0 = scmp.ne.s32.totalorder %s445_s0, %s305_s16  ;;  %s17_s13 = int_to_ptr.vmem [resolvable:$true] %s16_s13 }
   0x4   :  { %p309_p1 = scmp.lt.u32.totalorder %s305_s16, %s445_s0 }
   0x6   :  { %p311_p2 = pnand %p309_p1, %p306_p0 }
   0x8   :  { %314 = shalt.err (!%p311_p2)
}
   0x9   :  { %s315_s21 = scalar_lea.vmem %s17_s13, 128  ;;  %p320_p4 = scmp.lt.s32.totalorder %s17_s13, %s17_s13 }
   0xa   :  { %p316_p3 = scmp.ne.s32.totalorder %s17_s13, %s315_s21  ;;  %p321_p5 = scmp.lt.s32.totalorder %s315_s21, %s315_s21 }
   0xc   :  { %p322_p6 = por %p321_p5, %p320_p4 }
   0xe   :  { %p323_p7 = pnand %p322_p6, %p316_p3 }
  0x10   :  { %326 = shalt.err (!%p323_p7)
}
  0x11   :  { %s378_s22 = smov 64   ;;  %s379_s23 = smov 4  }
  0x12   :  { %22 = dma.hbm_to_vmem [thread:$0]  %s445_s0, 128, %s17_s13, [#allocation4], %s378_s22, %s378_s22, %s379_s23  }
  0x13   :  { %s380_s26 = smov [#allocation6]   ;;  %s327_s30 = scalar_lea.hbm %s446_s1, 1024 }
  0x14   :  { %s28_s27 = sshll.u32 %s380_s26, 4  ;;  %p328_p8 = scmp.ne.s32.totalorder %s446_s1, %s327_s30  ;;  %s29_s27 = int_to_ptr.vmem [resolvable:$true] %s28_s27 }
  0x15   :  { %p331_p9 = scmp.lt.u32.totalorder %s327_s30, %s446_s1 }
  0x17   :  { %p333_p10 = pnand %p331_p9, %p328_p8 }
  0x19   :  { %336 = shalt.err (!%p333_p10)
}
  0x1a   :  { %s337_s8 = scalar_lea.vmem %s29_s27, 1024  ;;  %p342_p12 = scmp.lt.s32.totalorder %s29_s27, %s29_s27 }
  0x1b   :  { %p338_p11 = scmp.ne.s32.totalorder %s29_s27, %s337_s8  ;;  %p343_p13 = scmp.lt.s32.totalorder %s337_s8, %s337_s8 }
  0x1d   :  { %p344_p0 = por %p343_p13, %p342_p12 }
  0x1f   :  { %p345_p1 = pnand %p344_p0, %p338_p11 }
  0x21   :  { %348 = shalt.err (!%p345_p1)
}
  0x22   :  { %34 = dma.hbm_to_vmem [thread:$0]  %s446_s1, 1024, %s29_s27, [#allocation7], %s378_s22, %s378_s22, %s379_s23  }
  0x23   :  { %371 = dma.done.wait [#allocation4], 128  }
  0x24   :  { %372 = vsyncadd [#allocation4], 4294967168 }
  0x25   :  { %373 = dma.done.wait [#allocation7], 1024  }
  0x26   :  { %374 = vsyncadd [#allocation7], 4294966272  ;;  %v381_v0 = vmov 0.0   ;;  %vm382_vm0 = vmmov 0   ;;  %v288_v1 = vld [vmem:[#allocation6] sm:$0xff]   ;;  %v289_v2 = vld [vmem:[#allocation6 + $0x8] sm:$0xff]   ;;  %v183_v27 = vlaneseq }
  0x27   :  { %259 = vmatprep.subr.bf16.mxu0 %v381_v0  ;;  %275 = vmatprep.mubr.msk.bf16.mxu0 %vm382_vm0, %v381_v0  ;;  %v290_v3 = vld [vmem:[#allocation6 + $0x10] sm:$0xff]   ;;  %v291_v4 = vld [vmem:[#allocation6 + $0x18] sm:$0xff]   ;;  %v292_v5 = vld [vmem:[#allocation6 + $0x20] sm:$0xff]  }
  0x28   :  { %260 = vmatpush3.bf16.msra.mxu0 %v288_v1  ;;  %v293_v6 = vld [vmem:[#allocation6 + $0x28] sm:$0xff]   ;;  %v294_v7 = vld [vmem:[#allocation6 + $0x30] sm:$0xff]   ;;  %v295_v8 = vld [vmem:[#allocation6 + $0x38] sm:$0xff]   ;;  %v184_v30 = vand.u32 127, %v183_v27 }
  0x29   :  { %261 = vmatprep.subr.bf16.mxu0 %v381_v0  ;;  %v296_v9 = vld [vmem:[#allocation3] sm:$0xff]  }
  0x2a   :  { %v249_v10 = vld [vmem:[%s447_s2] ss:$0 sm:$0xff]  ;;  %vm185_vm1 = vcmp.ge.s32.totalorder %v184_v30, 16  ;;  %vm186_vm2 = vcmp.lt.s32.totalorder %v184_v30, 32  ;;  %s383_s2 = smov [#allocation8]  }
  0x2b   :  { %vm187_vm4 = vmand %vm185_vm1, %vm186_vm2  ;;  %s227_s11 = sshll.u32 %s383_s2, 4  ;;  %s228_s11 = int_to_ptr.vmem [resolvable:$true] %s227_s11 }
  0x2c   :  { %262 = vmatpush3.bf16.msra.mxu0 %v289_v2  ;;  %s349_s12 = scalar_lea.vmem %s228_s11, 256  ;;  %p354_p3 = scmp.lt.s32.totalorder %s228_s11, %s228_s11 }
  0x2d   :  { %263 = vmatprep.subr.bf16.mxu0 %v381_v0  ;;  %p350_p2 = scmp.ne.s32.totalorder %s228_s11, %s349_s12  ;;  %p355_p4 = scmp.lt.s32.totalorder %s349_s12, %s349_s12 }
  0x2f   :  { %p356_p5 = por %p355_p4, %p354_p3 }
  0x30   :  { %264 = vmatpush3.bf16.msra.mxu0 %v290_v3 }
  0x31   :  { %265 = vmatprep.subr.bf16.mxu0 %v381_v0  ;;  %p357_p6 = pnand %p356_p5, %p350_p2 }
  0x34   :  { %266 = vmatpush3.bf16.msra.mxu0 %v291_v4 }
  0x35   :  { %267 = vmatprep.subr.bf16.mxu0 %v381_v0 }
  0x38   :  { %268 = vmatpush3.bf16.msra.mxu0 %v292_v5 }
  0x39   :  { %269 = vmatprep.subr.bf16.mxu0 %v381_v0 }
  0x3c   :  { %270 = vmatpush3.bf16.msra.mxu0 %v293_v6 }
  0x3d   :  { %271 = vmatprep.subr.bf16.mxu0 %v381_v0 }
  0x40   :  { %272 = vmatpush3.bf16.msra.mxu0 %v294_v7 }
  0x41   :  { %273 = vmatprep.subr.bf16.mxu0 %v381_v0 }
  0x44   :  { %274 = vmatpush3.bf16.msra.mxu0 %v295_v8 }
  0x47   :  { %276 = vmatmul.mubr.bf16.vlgmr.msra.gmra.mrb[0].mxu0 %v296_v9 }
 0x11a   :  { %v158_v11 = vpop.f32.mrb[0].mxu0 }
 0x11b   :  { %v181_v12 = vadd.f32 %v249_v10, %v158_v11  ;;  %v277_v13 = vpop.f32.mrb[1].mxu0 }
 0x11c   :  { %v161_v14 = vpop.f32.mrb[2].mxu0 }
 0x11d   :  { %v190_v15 = vand.u32 2147483647, %v181_v12  ;;  %v182_v16 = vadd.f32 %v249_v10, %v161_v14  ;;  %v278_v17 = vpop.f32.mrb[3].mxu0  ;;  %v188_v39 = vmax.f32 %v181_v12, 0.0 }
 0x11f   :  { %v192_v18 = vsub.f32 0.0, %v190_v15  ;;  %v191_v19 = vand.u32 2147483647, %v182_v16  ;;  %v189_v44 = vmax.f32 %v182_v16, 0.0 }
 0x121   :  { %v194_v20 = vmul.f32 1.442695, %v192_v18  ;;  %v193_v21 = vsub.f32 0.0, %v191_v19 }
 0x123   :  { %297 = vpow2.f32 %v194_v20  ;;  %v196_v22 = vmul.f32 1.442695, %v193_v21 }
 0x125   :  { %299 = vpow2.f32 %v196_v22 }
 0x12d   :  { %v298_v23 = vpop.eup %297 }
 0x12e   :  { %v198_v24 = vadd.f32 1.0, %v298_v23  ;;  %v201_v28 = vmul.f32 -0.5, %v298_v23  ;;  %v204_v32 = vand.u32 2147483647, %v298_v23 }
 0x12f   :  { %v300_v25 = vpop.eup %299 }
 0x130   :  { %301 = vlog2.f32 %v198_v24  ;;  %v207_v26 = vadd.f32 1.0, %v300_v25  ;;  %v210_v29 = vmul.f32 -0.5, %v300_v25  ;;  %v202_v31 = vadd.f32 1.0, %v201_v28 }
 0x131   :  { %v213_v35 = vand.u32 2147483647, %v300_v25  ;;  %vm205_vm3 = vcmp.lt.f32.partialorder %v204_v32, 0.0004427343 }
 0x132   :  { %303 = vlog2.f32 %v207_v26  ;;  %v211_v33 = vadd.f32 1.0, %v210_v29  ;;  %v203_v37 = vmul.f32 %v298_v23, %v202_v31 }
 0x133   :  { %vm214_vm5 = vcmp.lt.f32.partialorder %v213_v35, 0.0004427343 }
 0x134   :  { %v212_v42 = vmul.f32 %v300_v25, %v211_v33 }
 0x13a   :  { %v302_v34 = vpop.eup %301 }
 0x13b   :  { %v200_v36 = vmul.f32 0.6931472, %v302_v34 }
 0x13c   :  { %v304_v38 = vpop.eup %303 }
 0x13d   :  { %v206_v40 = vsel %vm205_vm3, %v203_v37, %v200_v36  ;;  %v209_v41 = vmul.f32 0.6931472, %v304_v38 }
 0x13e   :  { %v216_v43 = vadd.f32 %v206_v40, %v188_v39 }
 0x13f   :  { %v215_v45 = vsel %vm214_vm5, %v212_v42, %v209_v41 }
 0x140   :  { %v218_v46 = vsel %vm187_vm4, %v216_v43, %v181_v12  ;;  %v217_v47 = vadd.f32 %v215_v45, %v189_v44 }
 0x141   :  { %220 = vst [vmem:[#allocation8] sm:$0xff] %v218_v46 }
 0x142   :  { %v219_v48 = vsel %vm187_vm4, %v217_v47, %v182_v16 }
 0x143   :  { %221 = vst [vmem:[#allocation8 + $0x8] sm:$0xff] %v219_v48 }
 0x144   :  { %360 = shalt.err (!%p357_p6)
}
 0x145   :  { %s361_s15 = scalar_lea.hbm %s448_s3, 256 }
 0x146   :  { %p362_p7 = scmp.ne.s32.totalorder %s448_s3, %s361_s15  ;;  %p365_p8 = scmp.lt.u32.totalorder %s361_s15, %s448_s3 }
 0x148   :  { %p367_p9 = pnand %p365_p8, %p362_p7 }
 0x14a   :  { %370 = shalt.err (!%p367_p9)
}
 0x14b   :  { %s384_s20 = smov 128   ;;  %s385_s21 = smov 8  }
 0x14c   :  { %233 = dma.vmem_to_hbm [thread:$0]  %s228_s11, 256, %s448_s3, [#allocation5], %s384_s20, %s384_s20, %s385_s21  }
 0x14d   :  { %375 = dma.done.wait [#allocation5], 256  }
 0x14e   :  { %376 = vsyncadd [#allocation5], 4294967040 }
 0x14f   :  { %237 = vsyncpa [#allocation4], 1 }
 0x150   :  { %238 = vsyncpa [#allocation7], 1 }
 0x151   :  { %239 = vsyncpa [#allocation5], 1 }

</bundles_post_ra>
